<compile_context>
chip_gen: v7x
topology: tpu7x:2x2x1
jax: 0.10.0
libtpu: 0.0.40
codegen_flags: <defaults>
</compile_context>

<pallas_src>
import functools

import jax
import jax.numpy as jnp
from jax.experimental import pallas as pl
from jax.experimental.pallas import tpu as pltpu


# ----------------------------------------------------------------------------
# Fused Pallas kernel: all TrackLayers + output Linear for one track group
# ----------------------------------------------------------------------------
def _fused_kernel(*refs, num_layers, tracks_per_group, pts_per_track, d0,
                  eps=1e-5):
    # ref order: x, then per layer (w, b, gamma, beta), then w_out, b_out, out
    idx = 0
    x_ref = refs[idx]; idx += 1
    layer_refs = []
    for _ in range(num_layers):
        layer_refs.append(tuple(refs[idx:idx + 4]))
        idx += 4
    w_out_ref, b_out_ref, o_ref = refs[idx], refs[idx + 1], refs[idx + 2]

    TG, P, D0 = tracks_per_group, pts_per_track, d0

    # Raw point state, cast once to bf16 for all MXU uses (epilogue stays f32).
    x0_bf = x_ref[...].astype(jnp.bfloat16)                       # (TG*P, D0)

    pools = []    # per-track pooled features from previous layers, f32 (TG, Dj)
    widths = []   # their widths == row widths of the matching weight slices
    for layer, (w_ref, b_ref, g_ref, be_ref) in enumerate(layer_refs):
        Dl = D0 * (2 ** layer)

        # Point-state part of the (virtual) concat input: (TG*P, D0)x(D0, Dl).
        lin = jnp.dot(x0_bf, w_ref[:D0, :].astype(jnp.bfloat16),
                      preferred_element_type=jnp.float32)
        lin = lin.reshape(TG, P, Dl)                              # 3D view

        # Broadcast halves are row-constant per track: contract at track
        # granularity (TG rows) and broadcast once -> no (N, 2D) concat.
        row = D0
        track_bias = None
        for pool_prev, wdt in zip(pools, widths):
            c = jnp.dot(pool_prev.astype(jnp.bfloat16),
                        w_ref[row:row + wdt, :].astype(jnp.bfloat16),
                        preferred_element_type=jnp.float32)       # (TG, Dl)
            track_bias = c if track_bias is None else track_bias + c
            row += wdt
        if track_bias is not None:
            lin = lin + track_bias[:, None, :]
        lin = lin + b_ref[...]                                    # (1, Dl) bcast

        # LayerNorm (single cross-lane pass) + affine + ReLU, all f32.
        s = jnp.sum(lin, axis=-1, keepdims=True)
        s2 = jnp.sum(lin * lin, axis=-1, keepdims=True)
        mu = s * (1.0 / Dl)
        var = s2 * (1.0 / Dl) - mu * mu
        h = (lin - mu) * jax.lax.rsqrt(var + eps)
        h = h * g_ref[...] + be_ref[...]
        h = jnp.maximum(h, 0.0)                                   # (TG, P, Dl)

        # point_to_track + fn.max  ->  per-track segment max (one reduce).
        pools.append(jnp.max(h, axis=1))                          # (TG, Dl)
        widths.append(Dl)

    # Output Linear on the final track features.
    out = jnp.dot(pools[-1].astype(jnp.bfloat16),
                  w_out_ref[...].astype(jnp.bfloat16),
                  preferred_element_type=jnp.float32) + b_out_ref[...]
    o_ref[...] = out.reshape(1, TG, out.shape[-1])


# ----------------------------------------------------------------------------
# Wrapper: single pallas_call for the whole forward pass
# ----------------------------------------------------------------------------
def sub_track_model(point_feats, params, *, num_tracks, pts_per_track,
                    tracks_per_group=None):
    N, d0 = point_feats.shape
    assert N == num_tracks * pts_per_track
    layers = params["layers"]
    num_layers = len(layers)
    w_out, b_out = params["w_out"], params["b_out"]
    out_size = w_out.shape[1]

    # Split tracks into groups -> grid axis marked "parallel" (v7x megacore).
    if tracks_per_group is None:
        tracks_per_group = num_tracks
        half = num_tracks // 2
        if num_tracks % 2 == 0 and (half * pts_per_track) % 8 == 0:
            tracks_per_group = half
    assert num_tracks % tracks_per_group == 0
    num_groups = num_tracks // tracks_per_group
    np_per_group = tracks_per_group * pts_per_track

    inputs = [point_feats]
    in_specs = [pl.BlockSpec((np_per_group, d0), lambda g: (g, 0))]
    for (w, b, gmm, bta) in layers:
        dl = w.shape[0]
        inputs += [w, b.reshape(1, dl), gmm.reshape(1, dl), bta.reshape(1, dl)]
        in_specs += [
            pl.BlockSpec(w.shape, lambda g: (0, 0)),
            pl.BlockSpec((1, dl), lambda g: (0, 0)),
            pl.BlockSpec((1, dl), lambda g: (0, 0)),
            pl.BlockSpec((1, dl), lambda g: (0, 0)),
        ]
    inputs += [w_out, b_out.reshape(1, out_size)]
    in_specs += [
        pl.BlockSpec(w_out.shape, lambda g: (0, 0)),
        pl.BlockSpec((1, out_size), lambda g: (0, 0)),
    ]

    kernel = functools.partial(_fused_kernel,
                               num_layers=num_layers,
                               tracks_per_group=tracks_per_group,
                               pts_per_track=pts_per_track,
                               d0=d0)

    # TODO(synk): the final (T, O) store is sub-128-lane (masked vst); it is
    # the only HBM write left, so this is negligible -- pad O if it grows.
    out = pl.pallas_call(
        kernel,
        out_shape=jax.ShapeDtypeStruct(
            (num_groups, tracks_per_group, out_size), jnp.float32),
        grid=(num_groups,),
        in_specs=in_specs,
        out_specs=pl.BlockSpec((1, tracks_per_group, out_size),
                               lambda g: (g, 0, 0)),
        compiler_params=pltpu.CompilerParams(
            dimension_semantics=("parallel",)),
    )(*inputs)
    return out.reshape(num_tracks, out_size)


# ----------------------------------------------------------------------------
# Pure-JAX reference (original module semantics, for correctness checking)
# ----------------------------------------------------------------------------
def reference(point_feats, params, *, num_tracks, pts_per_track, eps=1e-5,
              matmul_dtype=jnp.float32):
    def mm(a, b):
        return jnp.dot(a.astype(matmul_dtype), b.astype(matmul_dtype),
                       preferred_element_type=jnp.float32)

    x = point_feats
    pool = None
    for (w, b, g, be) in params["layers"]:
        h = mm(x, w) + b
        mu = h.mean(-1, keepdims=True)
        var = ((h - mu) ** 2).mean(-1, keepdims=True)
        h = (h - mu) / jnp.sqrt(var + eps) * g + be
        h = jnp.maximum(h, 0.0)
        D = h.shape[-1]
        pool = h.reshape(num_tracks, pts_per_track, D).max(axis=1)    # (T, D)
        bcast = jnp.repeat(pool, pts_per_track, axis=0)               # (N, D)
        x = jnp.concatenate([x, bcast], axis=1)                       # (N, 2D)
    return mm(pool, params["w_out"]) + params["b_out"]


# ----------------------------------------------------------------------------
# Deterministic parameter init + demo
# ----------------------------------------------------------------------------
def init_params(key, input_size, num_layers, output_size):
    layers = []
    for i in range(num_layers):
        D = input_size * 2 ** i
        key, kw, kb = jax.random.split(key, 3)
        w = 0.1 * jax.random.normal(kw, (D, D), jnp.float32)
        b = 0.1 * jax.random.normal(kb, (D,), jnp.float32)
        gamma = jnp.ones((D,), jnp.float32)
        beta = jnp.zeros((D,), jnp.float32)
        layers.append((w, b, gamma, beta))
    D_last = input_size * 2 ** (num_layers - 1)
    key, kw, kb = jax.random.split(key, 3)
    w_out = 0.1 * jax.random.normal(kw, (D_last, output_size), jnp.float32)
    b_out = 0.1 * jax.random.normal(kb, (output_size,), jnp.float32)
    return {"layers": layers, "w_out": w_out, "b_out": b_out}


if __name__ == "__main__":
    INPUT_SIZE = 32     # per-point feature size at layer 0
    NUM_LAYERS = 2
    OUTPUT_SIZE = 8
    NUM_TRACKS = 4
    PTS_PER_TRACK = 8
    N_POINTS = NUM_TRACKS * PTS_PER_TRACK   # 32

    key = jax.random.PRNGKey(0)
    key, kx = jax.random.split(key)
    point_feats = jax.random.normal(kx, (N_POINTS, INPUT_SIZE), jnp.float32)
    params = init_params(key, INPUT_SIZE, NUM_LAYERS, OUTPUT_SIZE)

    fwd = jax.jit(functools.partial(sub_track_model,
                                    num_tracks=NUM_TRACKS,
                                    pts_per_track=PTS_PER_TRACK))
    out = jax.block_until_ready(fwd(point_feats, params))

    # Tight check vs. a reference using the same bf16 MXU-operand precision,
    # loose check vs. the full-f32 original-semantics reference.
    ref_bf16 = reference(point_feats, params, num_tracks=NUM_TRACKS,
                         pts_per_track=PTS_PER_TRACK,
                         matmul_dtype=jnp.bfloat16)
    ref_f32 = reference(point_feats, params, num_tracks=NUM_TRACKS,
                        pts_per_track=PTS_PER_TRACK,
                        matmul_dtype=jnp.float32)

    assert out.shape == (NUM_TRACKS, OUTPUT_SIZE)
    assert jnp.allclose(out, ref_bf16, atol=3e-3, rtol=3e-3), \
        "mismatch vs bf16-matched reference"
    assert jnp.allclose(out, ref_f32, atol=5e-2, rtol=5e-2), \
        "mismatch vs f32 reference"
    print("KERNEL_OK")
</pallas_src>

<mosaic_0001>
module attributes {stable_mosaic.version = 11 : i64} {
  func.func @_fused_kernel(%arg0: i32, %arg1: memref<16x32xf32, #tpu.memory_space<vmem>>, %arg2: memref<32x32xf32, #tpu.memory_space<vmem>>, %arg3: memref<1x32xf32, #tpu.memory_space<vmem>>, %arg4: memref<1x32xf32, #tpu.memory_space<vmem>>, %arg5: memref<1x32xf32, #tpu.memory_space<vmem>>, %arg6: memref<64x64xf32, #tpu.memory_space<vmem>>, %arg7: memref<1x64xf32, #tpu.memory_space<vmem>>, %arg8: memref<1x64xf32, #tpu.memory_space<vmem>>, %arg9: memref<1x64xf32, #tpu.memory_space<vmem>>, %arg10: memref<64x8xf32, #tpu.memory_space<vmem>>, %arg11: memref<1x8xf32, #tpu.memory_space<vmem>>, %arg12: memref<1x2x8xf32, #tpu.memory_space<vmem>>) attributes {dimension_semantics = [#tpu.dimension_semantics<parallel>], iteration_bounds = array<i64: 2>, scalar_prefetch = 0 : i64, scratch_operands = 0 : i64, tpu.core_type = #tpu.core_type<tc>, window_params = [{transform_indices = @transform_0, window_bounds = array<i64: 16, 32>}, {pipeline_mode = #tpu.pipeline_mode<synchronous>, transform_indices = @transform_1, window_bounds = array<i64: 32, 32>}, {pipeline_mode = #tpu.pipeline_mode<synchronous>, transform_indices = @transform_2, window_bounds = array<i64: 1, 32>}, {pipeline_mode = #tpu.pipeline_mode<synchronous>, transform_indices = @transform_3, window_bounds = array<i64: 1, 32>}, {pipeline_mode = #tpu.pipeline_mode<synchronous>, transform_indices = @transform_4, window_bounds = array<i64: 1, 32>}, {pipeline_mode = #tpu.pipeline_mode<synchronous>, transform_indices = @transform_5, window_bounds = array<i64: 64, 64>}, {pipeline_mode = #tpu.pipeline_mode<synchronous>, transform_indices = @transform_6, window_bounds = array<i64: 1, 64>}, {pipeline_mode = #tpu.pipeline_mode<synchronous>, transform_indices = @transform_7, window_bounds = array<i64: 1, 64>}, {pipeline_mode = #tpu.pipeline_mode<synchronous>, transform_indices = @transform_8, window_bounds = array<i64: 1, 64>}, {pipeline_mode = #tpu.pipeline_mode<synchronous>, transform_indices = @transform_9, window_bounds = array<i64: 64, 8>}, {pipeline_mode = #tpu.pipeline_mode<synchronous>, transform_indices = @transform_10, window_bounds = array<i64: 1, 8>}, {transform_indices = @transform_11, window_bounds = array<i64: 1, 2, 8>}]} {
    %c0 = arith.constant 0 : index
    %c0_0 = arith.constant 0 : index
    %0 = vector.load %arg1[%c0, %c0_0] : memref<16x32xf32, #tpu.memory_space<vmem>>, vector<16x32xf32>
    %1 = arith.truncf %0 : vector<16x32xf32> to vector<16x32xbf16>
    %c0_1 = arith.constant 0 : index
    %c0_2 = arith.constant 0 : index
    %2 = vector.load %arg2[%c0_1, %c0_2] : memref<32x32xf32, #tpu.memory_space<vmem>>, vector<32x32xf32>
    %3 = arith.truncf %2 : vector<32x32xf32> to vector<32x32xbf16>
    %cst = arith.constant dense<0.000000e+00> : vector<16x32xf32>
    %4 = tpu.matmul %1, %3, %cst {dimension_numbers = #tpu.dot_dimension_numbers<[1], [0], [0], [1], [0, 0, 1, 1], [], []>} : vector<16x32xbf16>, vector<32x32xbf16>, vector<16x32xf32> -> vector<16x32xf32>
    %5 = vector.shape_cast %4 : vector<16x32xf32> to vector<2x8x32xf32>
    %c0_3 = arith.constant 0 : index
    %c0_4 = arith.constant 0 : index
    %6 = vector.load %arg3[%c0_3, %c0_4] : memref<1x32xf32, #tpu.memory_space<vmem>>, vector<1x32xf32>
    %7 = vector.shape_cast %6 : vector<1x32xf32> to vector<1x1x32xf32>
    %8 = vector.broadcast %7 : vector<1x1x32xf32> to vector<2x8x32xf32>
    %9 = arith.addf %5, %8 : vector<2x8x32xf32>
    %cst_5 = arith.constant dense<0.000000e+00> : vector<2x8xf32>
    %10 = vector.multi_reduction <add>, %9, %cst_5 [2] : vector<2x8x32xf32> to vector<2x8xf32>
    %11 = vector.shape_cast %10 : vector<2x8xf32> to vector<2x8x1xf32>
    %12 = arith.mulf %9, %9 : vector<2x8x32xf32>
    %cst_6 = arith.constant dense<0.000000e+00> : vector<2x8xf32>
    %13 = vector.multi_reduction <add>, %12, %cst_6 [2] : vector<2x8x32xf32> to vector<2x8xf32>
    %14 = vector.shape_cast %13 : vector<2x8xf32> to vector<2x8x1xf32>
    %cst_7 = arith.constant 3.125000e-02 : f32
    %15 = vector.broadcast %cst_7 : f32 to vector<2x8x1xf32>
    %16 = arith.mulf %11, %15 : vector<2x8x1xf32>
    %cst_8 = arith.constant 3.125000e-02 : f32
    %17 = vector.broadcast %cst_8 : f32 to vector<2x8x1xf32>
    %18 = arith.mulf %14, %17 : vector<2x8x1xf32>
    %19 = arith.mulf %16, %16 : vector<2x8x1xf32>
    %20 = arith.subf %18, %19 : vector<2x8x1xf32>
    %21 = vector.broadcast %16 : vector<2x8x1xf32> to vector<2x8x32xf32>
    %22 = arith.subf %9, %21 : vector<2x8x32xf32>
    %cst_9 = arith.constant 9.99999974E-6 : f32
    %23 = vector.broadcast %cst_9 : f32 to vector<2x8x1xf32>
    %24 = arith.addf %20, %23 : vector<2x8x1xf32>
    %25 = math.rsqrt %24 : vector<2x8x1xf32>
    %26 = vector.broadcast %25 : vector<2x8x1xf32> to vector<2x8x32xf32>
    %27 = arith.mulf %22, %26 : vector<2x8x32xf32>
    %c0_10 = arith.constant 0 : index
    %c0_11 = arith.constant 0 : index
    %28 = vector.load %arg4[%c0_10, %c0_11] : memref<1x32xf32, #tpu.memory_space<vmem>>, vector<1x32xf32>
    %29 = vector.shape_cast %28 : vector<1x32xf32> to vector<1x1x32xf32>
    %30 = vector.broadcast %29 : vector<1x1x32xf32> to vector<2x8x32xf32>
    %31 = arith.mulf %27, %30 : vector<2x8x32xf32>
    %c0_12 = arith.constant 0 : index
    %c0_13 = arith.constant 0 : index
    %32 = vector.load %arg5[%c0_12, %c0_13] : memref<1x32xf32, #tpu.memory_space<vmem>>, vector<1x32xf32>
    %33 = vector.shape_cast %32 : vector<1x32xf32> to vector<1x1x32xf32>
    %34 = vector.broadcast %33 : vector<1x1x32xf32> to vector<2x8x32xf32>
    %35 = arith.addf %31, %34 : vector<2x8x32xf32>
    %cst_14 = arith.constant 0.000000e+00 : f32
    %36 = vector.broadcast %cst_14 : f32 to vector<2x8x32xf32>
    %37 = arith.maximumf %35, %36 : vector<2x8x32xf32>
    %cst_15 = arith.constant dense<0xFF800000> : vector<2x32xf32>
    %38 = vector.multi_reduction <maximumf>, %37, %cst_15 [1] : vector<2x8x32xf32> to vector<2x32xf32>
    %c0_16 = arith.constant 0 : index
    %c0_17 = arith.constant 0 : index
    %39 = vector.load %arg6[%c0_16, %c0_17] : memref<64x64xf32, #tpu.memory_space<vmem>>, vector<32x64xf32>
    %40 = arith.truncf %39 : vector<32x64xf32> to vector<32x64xbf16>
    %cst_18 = arith.constant dense<0.000000e+00> : vector<16x64xf32>
    %41 = tpu.matmul %1, %40, %cst_18 {dimension_numbers = #tpu.dot_dimension_numbers<[1], [0], [0], [1], [0, 0, 1, 1], [], []>} : vector<16x32xbf16>, vector<32x64xbf16>, vector<16x64xf32> -> vector<16x64xf32>
    %42 = vector.shape_cast %41 : vector<16x64xf32> to vector<2x8x64xf32>
    %43 = arith.truncf %38 : vector<2x32xf32> to vector<2x32xbf16>
    %c32 = arith.constant 32 : index
    %c0_19 = arith.constant 0 : index
    %44 = vector.load %arg6[%c32, %c0_19] : memref<64x64xf32, #tpu.memory_space<vmem>>, vector<32x64xf32>
    %45 = arith.truncf %44 : vector<32x64xf32> to vector<32x64xbf16>
    %cst_20 = arith.constant dense<0.000000e+00> : vector<2x64xf32>
    %46 = tpu.matmul %43, %45, %cst_20 {dimension_numbers = #tpu.dot_dimension_numbers<[1], [0], [0], [1], [0, 0, 1, 1], [], []>} : vector<2x32xbf16>, vector<32x64xbf16>, vector<2x64xf32> -> vector<2x64xf32>
    %47 = vector.shape_cast %46 : vector<2x64xf32> to vector<2x1x64xf32>
    %48 = vector.broadcast %47 : vector<2x1x64xf32> to vector<2x8x64xf32>
    %49 = arith.addf %42, %48 : vector<2x8x64xf32>
    %c0_21 = arith.constant 0 : index
    %c0_22 = arith.constant 0 : index
    %50 = vector.load %arg7[%c0_21, %c0_22] : memref<1x64xf32, #tpu.memory_space<vmem>>, vector<1x64xf32>
    %51 = vector.shape_cast %50 : vector<1x64xf32> to vector<1x1x64xf32>
    %52 = vector.broadcast %51 : vector<1x1x64xf32> to vector<2x8x64xf32>
    %53 = arith.addf %49, %52 : vector<2x8x64xf32>
    %cst_23 = arith.constant dense<0.000000e+00> : vector<2x8xf32>
    %54 = vector.multi_reduction <add>, %53, %cst_23 [2] : vector<2x8x64xf32> to vector<2x8xf32>
    %55 = vector.shape_cast %54 : vector<2x8xf32> to vector<2x8x1xf32>
    %56 = arith.mulf %53, %53 : vector<2x8x64xf32>
    %cst_24 = arith.constant dense<0.000000e+00> : vector<2x8xf32>
    %57 = vector.multi_reduction <add>, %56, %cst_24 [2] : vector<2x8x64xf32> to vector<2x8xf32>
    %58 = vector.shape_cast %57 : vector<2x8xf32> to vector<2x8x1xf32>
    %cst_25 = arith.constant 1.562500e-02 : f32
    %59 = vector.broadcast %cst_25 : f32 to vector<2x8x1xf32>
    %60 = arith.mulf %55, %59 : vector<2x8x1xf32>
    %cst_26 = arith.constant 1.562500e-02 : f32
    %61 = vector.broadcast %cst_26 : f32 to vector<2x8x1xf32>
    %62 = arith.mulf %58, %61 : vector<2x8x1xf32>
    %63 = arith.mulf %60, %60 : vector<2x8x1xf32>
    %64 = arith.subf %62, %63 : vector<2x8x1xf32>
    %65 = vector.broadcast %60 : vector<2x8x1xf32> to vector<2x8x64xf32>
    %66 = arith.subf %53, %65 : vector<2x8x64xf32>
    %cst_27 = arith.constant 9.99999974E-6 : f32
    %67 = vector.broadcast %cst_27 : f32 to vector<2x8x1xf32>
    %68 = arith.addf %64, %67 : vector<2x8x1xf32>
    %69 = math.rsqrt %68 : vector<2x8x1xf32>
    %70 = vector.broadcast %69 : vector<2x8x1xf32> to vector<2x8x64xf32>
    %71 = arith.mulf %66, %70 : vector<2x8x64xf32>
    %c0_28 = arith.constant 0 : index
    %c0_29 = arith.constant 0 : index
    %72 = vector.load %arg8[%c0_28, %c0_29] : memref<1x64xf32, #tpu.memory_space<vmem>>, vector<1x64xf32>
    %73 = vector.shape_cast %72 : vector<1x64xf32> to vector<1x1x64xf32>
    %74 = vector.broadcast %73 : vector<1x1x64xf32> to vector<2x8x64xf32>
    %75 = arith.mulf %71, %74 : vector<2x8x64xf32>
    %c0_30 = arith.constant 0 : index
    %c0_31 = arith.constant 0 : index
    %76 = vector.load %arg9[%c0_30, %c0_31] : memref<1x64xf32, #tpu.memory_space<vmem>>, vector<1x64xf32>
    %77 = vector.shape_cast %76 : vector<1x64xf32> to vector<1x1x64xf32>
    %78 = vector.broadcast %77 : vector<1x1x64xf32> to vector<2x8x64xf32>
    %79 = arith.addf %75, %78 : vector<2x8x64xf32>
    %cst_32 = arith.constant 0.000000e+00 : f32
    %80 = vector.broadcast %cst_32 : f32 to vector<2x8x64xf32>
    %81 = arith.maximumf %79, %80 : vector<2x8x64xf32>
    %cst_33 = arith.constant dense<0xFF800000> : vector<2x64xf32>
    %82 = vector.multi_reduction <maximumf>, %81, %cst_33 [1] : vector<2x8x64xf32> to vector<2x64xf32>
    %83 = arith.truncf %82 : vector<2x64xf32> to vector<2x64xbf16>
    %c0_34 = arith.constant 0 : index
    %c0_35 = arith.constant 0 : index
    %84 = vector.load %arg10[%c0_34, %c0_35] : memref<64x8xf32, #tpu.memory_space<vmem>>, vector<64x8xf32>
    %85 = arith.truncf %84 : vector<64x8xf32> to vector<64x8xbf16>
    %cst_36 = arith.constant dense<0.000000e+00> : vector<2x8xf32>
    %86 = tpu.matmul %83, %85, %cst_36 {dimension_numbers = #tpu.dot_dimension_numbers<[1], [0], [0], [1], [0, 0, 1, 1], [], []>} : vector<2x64xbf16>, vector<64x8xbf16>, vector<2x8xf32> -> vector<2x8xf32>
    %c0_37 = arith.constant 0 : index
    %c0_38 = arith.constant 0 : index
    %87 = vector.load %arg11[%c0_37, %c0_38] : memref<1x8xf32, #tpu.memory_space<vmem>>, vector<1x8xf32>
    %88 = vector.broadcast %87 : vector<1x8xf32> to vector<2x8xf32>
    %89 = arith.addf %86, %88 : vector<2x8xf32>
    %90 = vector.shape_cast %89 : vector<2x8xf32> to vector<1x2x8xf32>
    %c0_39 = arith.constant 0 : index
    %c0_40 = arith.constant 0 : index
    %c0_41 = arith.constant 0 : index
    %91 = vector.load %arg12[%c0_39, %c0_40, %c0_41] : memref<1x2x8xf32, #tpu.memory_space<vmem>>, vector<1x2x8xf32>
    tpu.vector_store %arg12[%c0_39, %c0_40, %c0_41], %90 {strides = array<i32>} : memref<1x2x8xf32, #tpu.memory_space<vmem>>, vector<1x2x8xf32>,
    return
  }
  func.func @transform_0(%arg0: i32) -> (i32, i32) {
    %c0_i32 = arith.constant 0 : i32
    %c0_i32_0 = arith.constant 0 : i32
    return %arg0, %c0_i32 : i32, i32
  }
  func.func @transform_1(%arg0: i32) -> (i32, i32) {
    %c0_i32 = arith.constant 0 : i32
    %c0_i32_0 = arith.constant 0 : i32
    %c0_i32_1 = arith.constant 0 : i32
    return %c0_i32, %c0_i32_0 : i32, i32
  }
  func.func @transform_2(%arg0: i32) -> (i32, i32) {
    %c0_i32 = arith.constant 0 : i32
    %c0_i32_0 = arith.constant 0 : i32
    %c0_i32_1 = arith.constant 0 : i32
    return %c0_i32, %c0_i32_0 : i32, i32
  }
  func.func @transform_3(%arg0: i32) -> (i32, i32) {
    %c0_i32 = arith.constant 0 : i32
    %c0_i32_0 = arith.constant 0 : i32
    %c0_i32_1 = arith.constant 0 : i32
    return %c0_i32, %c0_i32_0 : i32, i32
  }
  func.func @transform_4(%arg0: i32) -> (i32, i32) {
    %c0_i32 = arith.constant 0 : i32
    %c0_i32_0 = arith.constant 0 : i32
    %c0_i32_1 = arith.constant 0 : i32
    return %c0_i32, %c0_i32_0 : i32, i32
  }
  func.func @transform_5(%arg0: i32) -> (i32, i32) {
    %c0_i32 = arith.constant 0 : i32
    %c0_i32_0 = arith.constant 0 : i32
    %c0_i32_1 = arith.constant 0 : i32
    return %c0_i32, %c0_i32_0 : i32, i32
  }
  func.func @transform_6(%arg0: i32) -> (i32, i32) {
    %c0_i32 = arith.constant 0 : i32
    %c0_i32_0 = arith.constant 0 : i32
    %c0_i32_1 = arith.constant 0 : i32
    return %c0_i32, %c0_i32_0 : i32, i32
  }
  func.func @transform_7(%arg0: i32) -> (i32, i32) {
    %c0_i32 = arith.constant 0 : i32
    %c0_i32_0 = arith.constant 0 : i32
    %c0_i32_1 = arith.constant 0 : i32
    return %c0_i32, %c0_i32_0 : i32, i32
  }
  func.func @transform_8(%arg0: i32) -> (i32, i32) {
    %c0_i32 = arith.constant 0 : i32
    %c0_i32_0 = arith.constant 0 : i32
    %c0_i32_1 = arith.constant 0 : i32
    return %c0_i32, %c0_i32_0 : i32, i32
  }
  func.func @transform_9(%arg0: i32) -> (i32, i32) {
    %c0_i32 = arith.constant 0 : i32
    %c0_i32_0 = arith.constant 0 : i32
    %c0_i32_1 = arith.constant 0 : i32
    return %c0_i32, %c0_i32_0 : i32, i32
  }
  func.func @transform_10(%arg0: i32) -> (i32, i32) {
    %c0_i32 = arith.constant 0 : i32
    %c0_i32_0 = arith.constant 0 : i32
    %c0_i32_1 = arith.constant 0 : i32
    return %c0_i32, %c0_i32_0 : i32, i32
  }
  func.func @transform_11(%arg0: i32) -> (i32, i32, i32) {
    %c0_i32 = arith.constant 0 : i32
    %c0_i32_0 = arith.constant 0 : i32
    %c0_i32_1 = arith.constant 0 : i32
    return %arg0, %c0_i32, %c0_i32_0 : i32, i32, i32
  }
}

</mosaic_0001>

<bundles_post_ra>
// kernel: sub_track_model.1
= control target key start
LH: loop header
LB: loop body
LE: loop exit
PB: predicated region body
PF: predicated region fallthrough
CT: control target
= control target key end

     0   :  { %16 = vsyncpa [#allocation3], 0  ;;  %s1440_s0 = inlined_call_operand.vmem [shape: f32[32,32], index: 0, kind: input, shape index: {}]   ;;  %s1441_s1 = inlined_call_operand.hbm [shape: f32[32,32], index: 1, kind: input, shape index: {}]   ;;  %s1442_s2 = inlined_call_operand.vmem [shape: f32[1,32], index: 2, kind: input, shape index: {}]   ;;  %s1443_s3 = inlined_call_operand.vmem [shape: f32[1,32], index: 3, kind: input, shape index: {}]   ;;  %s1444_s4 = inlined_call_operand.vmem [shape: f32[1,32], index: 4, kind: input, shape index: {}]   ;;  %s1445_s5 = inlined_call_operand.vmem [shape: f32[64,64], index: 5, kind: input, shape index: {}]   ;;  %s1446_s6 = inlined_call_operand.vmem [shape: f32[1,64], index: 6, kind: input, shape index: {}]   ;;  %s1447_s7 = inlined_call_operand.vmem [shape: f32[1,64], index: 7, kind: input, shape index: {}]   ;;  %s1448_s8 = inlined_call_operand.vmem [shape: f32[1,64], index: 8, kind: input, shape index: {}]   ;;  %s1449_s9 = inlined_call_operand.vmem [shape: f32[64,8], index: 9, kind: input, shape index: {}]   ;;  %s1450_s10 = inlined_call_operand.vmem [shape: f32[1,8], index: 10, kind: input, shape index: {}]   ;;  %s1451_s11 = inlined_call_operand.hbm [shape: f32[2,2,8], index: 11, kind: output, shape index: {}]  }
   0x1   :  { %17 = vsyncpa [#allocation4], 0 }
   0x2   :  { %19 = vsyncpa [#allocation4 + $0x1], 0  ;;  %s1201_s17 = smov 0   ;;  %s1203_s18 = smov 0  }
   0x3   :  { %s1205_s19 = smov 0   ;;  %s1207_s20 = smov 0  }
   0x4 LB: > { %s1222_s21 = sadd.s32 4294967295, %s1132_s20   ;;  %s901_s22 = sadd.s32 4294967294, %s1132_s20   ;;  %s1132_s20 = sphi %s1207_s20, %s1469_s20   ;;  %s1128_s19 = sphi %s1205_s19, %s1468_s19   ;;  %s1124_s18 = sphi %s1203_s18, %s1467_s18   ;;  %s1120_s17 = sphi %s1201_s17, %s1466_s17  }
   0x5   : > { %s1226_s23 = sadd.s32 1, %s1132_s20   ;;  %s268_s24 = sadd.s32 1, %s1128_s19 }
   0x6   : > { %s265_s25 = ssub.s32 %s1132_s20, %s1226_s23  ;;  %p278_p0 = scmp.ne.s32.totalorder %s1128_s19, %s1124_s18 }
   0x7   : > { %p266_p1 = scmp.eq.s32.totalorder %s265_s25, 0  ;;  %p279_p2 = scmp.eq.s32.totalorder %s1222_s21, 1 }
   0x8   : > { %p284_p3 = scmp.ne.s32.totalorder %s1124_s18, %s1120_s17  ;;  %p285_p4 = scmp.eq.s32.totalorder %s901_s22, 1 }
   0x9   : > { %s1237_s26 = scalar_select %p266_p1, %s1128_s19, %s268_s24  }
   0xa   : > { %p1239_p5 = por %p279_p2, %p278_p0  ;;  %p1243_p6 = por %p285_p4, %p284_p3 }
   0xb   : > { %1455 = sst [smem:[#allocation8_spill]] %s1237_s26  ;;  %p902_p7 = scmp.ge.s32.totalorder %s1132_s20, 1 }
   0xc   : > { %s1456_s27 = scalar_select %p1239_p5, 1, 0 }
   0xd   : > { %s1457_s28 = scalar_select %p1243_p6, 1, 0 }
   0xe   : > { %p292_p8 = scmp.lt.s32.totalorder %s1132_s20, 3  ;;  %p1452_p9 = scmp.eq.s32.totalorder %s1222_s21, 0 }
   0xf   : > { %s1134_s30 = smov [#allocation2]   ;;  %s1038_s16 = scalar_lea.hbm %s1441_s1, 512 }
  0x10   : > { %p1250_p10 = pnand %p902_p7, %p292_p8  ;;  %s304_s12 = sshll.u32 %s1134_s30, 4  ;;  %s305_s12 = int_to_ptr.vmem [resolvable:$true] %s304_s12 }
  0x11   : > { %p1039_p13 = scmp.ne.s32.totalorder %s1441_s1, %s1038_s16  ;;  %p1045_p3 = scmp.lt.u32.totalorder %s1038_s16, %s1441_s1 }
  0x12   : > { %s1458_s29 = scalar_select %p1250_p10, 1, 0 }
  0x13   : > { %p981_p11 = pneg %p1250_p10 }
  0x15   : > { %p1258_p12 = pnand %p1452_p9, %p981_p11 }
  0x17   : > { %p1040_p0 = pneg %p1258_p12 }
  0x19   : > { %p1041_p1 = pnand %p1040_p0, %p1039_p13 }
  0x1b   : > { %p1042_p2 = pneg %p1041_p1 }
  0x1d   : > { %p1047_p4 = pnand %p1045_p3, %p1042_p2 }
  0x1f   : > { %1050 = shalt.err (!%p1047_p4)
}
  0x20   : > { %s1051_s26 = scalar_lea.vmem %s305_s12, 512  ;;  %p1059_p9 = scmp.lt.s32.totalorder %s305_s12, %s305_s12 }
  0x21   : > { %p1052_p7 = scmp.ne.s32.totalorder %s305_s12, %s1051_s26  ;;  %p1060_p6 = scmp.lt.s32.totalorder %s1051_s26, %s1051_s26 }
  0x23   : > { %p1054_p8 = pnand %p1052_p7, %p1040_p0  ;;  %p1061_p5 = por %p1060_p6, %p1059_p9 }
  0x25   : > { %p1055_p11 = pneg %p1054_p8 }
  0x27   : > { %p1062_p10 = pnand %p1061_p5, %p1055_p11 }
  0x29   : > { %1065 = shalt.err (!%p1062_p10)
}
  0x2a   : > { %s1135_s14 = smov 128   ;;  %s1136_s15 = smov 8  }
  0x2b   : > { %984 = dma.hbm_to_vmem [thread:$0]  (!%p1258_p12), %s1441_s1, 512, %s305_s12, [#allocation3], %s1135_s14, %s1135_s14, %s1136_s15  }
  0x2c   : > { %p1460_p13 = scmp.ne.s32.totalorder %s1458_s29, 0 }
  0x2d   : > { %p1461_p1 = scmp.eq.s32.totalorder (!%p1460_p13), %s1222_s21, 0 }
  0x2e   : > { %356 = sbr.rel (%p1460_p13) target bundleno = 1116 (0x45c), region = 64 }
  0x35   : > { %1111 = dma.done.wait (%p1461_p1), [#allocation3], 512   ;;  %p1462_p0 = pmov %p1461_p1 }
  0x36   : > { %s908_s26 = sshll.u32 %s1222_s21, 1  ;;  %v1137_v0 = vmov 0.0   ;;  %vm1138_vm0 = vmmov 0   ;;  %v406_v1 = vld [vmem:[#allocation2] sm:$0xff]  ;;  %v407_v2 = vld [vmem:[#allocation2 + $0x8] sm:$0xff]  ;;  %v408_v3 = vld [vmem:[#allocation2 + $0x10] sm:$0xff] }
  0x37   : > { %1113 = vsyncadd (%p1462_p0), [#allocation3], 4294966784  ;;  %939 = vmatprep.subr.bf16.mxu0 %v1137_v0  ;;  %943 = vmatprep.mubr.msk.bf16.mxu0 %vm1138_vm0, %v1137_v0  ;;  %p397_p5 = scmp.lt.s32.totalorder %s908_s26, 3  ;;  %v410_v4 = vpack.c.bf16 %v407_v2, %v406_v1  ;;  %v409_v5 = vld [vmem:[#allocation2 + $0x18] sm:$0xff]  ;;  %vm412_vm1 = vcmask 261120   ;;  %v579_v23 = vld [vmem:[%s1445_s5 + $0x20] sm:$0xff] }
  0x38   : > { %947 = vmatprep.subr.bf16.mxu1 %v1137_v0  ;;  %951 = vmatprep.mubr.msk.bf16.mxu1 %vm1138_vm0, %v1137_v0  ;;  %v411_v6 = vpack.c.bf16 %v409_v5, %v408_v3  ;;  %v911_v10 = vld [vmem:[%s1442_s2] ss:$0 sm:$0xff]  ;;  %v580_v24 = vld [vmem:[%s1445_s5 + $0x28] sm:$0xff]  ;;  %v581_v28 = vld [vmem:[%s1445_s5 + $0x30] sm:$0xff]  ;;  %vm589_vm2 = vcmask 1041409   ;;  %vm679_vm3 = vcmask 523264  }
  0x39   : > { %s1471_s26 = smov (!%p397_p5, %s908_s26), 3  ;;  %940 = vmatpush3.bf16.msra.mxu0 %v410_v4  ;;  %v530_v25 = vld [vmem:[%s1445_s5] sm:$0xff]  ;;  %v583_v26 = vpack.c.bf16 %v580_v24, %v579_v23  ;;  %v531_v27 = vld [vmem:[%s1445_s5 + $0x8] sm:$0xff]  ;;  %v582_v29 = vld [vmem:[%s1445_s5 + $0x38] sm:$0xff]  ;;  %v1139_v24 = vmov 1966171168  }
  0x3a   : > { %s909_s29 = sshll.u32 %s1471_s26, 3  ;;  %941 = vmatprep.subr.bf16.mxu0 %v1137_v0  ;;  %v534_v30 = vpack.c.bf16 %v531_v27, %v530_v25  ;;  %v532_v31 = vld [vmem:[%s1445_s5 + $0x10] sm:$0xff]  ;;  %v533_v32 = vld [vmem:[%s1445_s5 + $0x18] sm:$0xff]  ;;  %v584_v33 = vpack.c.bf16 %v582_v29, %v581_v28  ;;  %v912_v51 = vld [vmem:[%s1443_s3] ss:$0 sm:$0xff]  ;;  %v637_v25 = vunpack.c.l.s4 %v1139_v24  ;;  %s393_s25 = sand.u32 1, %s1124_s18  }
  0x3b   : > { %s400_s16 = scalar_lea.vmem %s1440_s0, %s909_s29  ;;  %v535_v34 = vpack.c.bf16 %v533_v32, %v532_v31  ;;  %v913_v53 = vld [vmem:[%s1444_s4] ss:$0 sm:$0xff]  ;;  %s907_s30 = sshll.u32 %s393_s25, 1  ;;  %vm814_vm4 = vcmask 58368  }
  0x3c   : > { %v403_v7 = vld [vmem:[%s400_s16] sm:$0xff]  ;;  %v404_v8 = vld [vmem:[%s400_s16 + $0x8] sm:$0xff]  ;;  %948 = vmatpush3.bf16.msra.mxu1 %v534_v30  ;;  %v638_v27 = vunpack.c.0.s8 %v637_v25  ;;  %s922_s22 = sshll.u32 %s1222_s21, 5  ;;  %s395_s24 = scalar_lea.vmem [#allocation5], %s907_s30 }
  0x3d   : > { %v405_v9 = vpack.c.bf16 %v404_v8, %v403_v7  ;;  %942 = vmatpush3.bf16.msra.mxu0 %v411_v6  ;;  %949 = vmatprep.subr.bf16.mxu1 %v1137_v0  ;;  %s830_s26 = sshll.u32 %s395_s24, 4  ;;  %s1398_s13 = scalar_lea.hbm %s1451_s11, %s922_s22  ;;  %s1400_s26 = int_to_ptr.vmem [resolvable:$true] %s830_s26 }
  0x3e   : > { %955 = vmatprep.subr.bf16.mxu0 %v1137_v0  ;;  %s817_s21 = scalar_lea.sflag [#allocation4], %s393_s25  ;;  %s1066_s16 = scalar_lea.vmem %s1400_s26, 32 }
  0x3f   : > { %p1067_p6 = scmp.ne.s32.totalorder %s1400_s26, %s1066_s16  ;;  %p1463_p9 = scmp.ne.s32.totalorder %s1456_s27, 0 }
  0x40   : > { %944 = vmatmul.mubr.msk.bf16.vlgmr.msra.gmra.mrb[0].mxu0 %vm412_vm1, %v405_v9  ;;  %950 = vmatpush3.bf16.msra.mxu1 %v535_v34  ;;  %s1140_s30 = smov [#allocation5]  }
  0x41   : > { %959 = vmatprep.mubr.msk.bf16.mxu0 %vm1138_vm0, %v1137_v0  ;;  %956 = vmatpush3.bf16.msra.mxu0 %v583_v26  ;;  %v639_v26 = vlaneseq  ;;  %p1068_p10 = pnand %p1067_p6, %p1463_p9  ;;  %s1070_s14 = sshll.u32 %s1140_s30, 4  ;;  %s1071_s14 = int_to_ptr.vmem [resolvable:$false] %s1070_s14 }
  0x42   : > { %957 = vmatprep.subr.bf16.mxu0 %v1137_v0  ;;  %963 = vmatprep.subr.bf16.mxu1 %v1137_v0  ;;  %s1072_s15 = scalar_lea.vmem %s1071_s14, 64  ;;  %p1073_p2 = scmp.lt.s32.totalorder %s1400_s26, %s1071_s14 }
  0x43   : > { %952 = vmatmul.mubr.msk.bf16.vlgmr.msra.gmra.mrb[0].mxu1 %vm412_vm1, %v405_v9  ;;  %v640_v28 = vshrl.u32 %v639_v26, 7  ;;  %p1069_p12 = pneg %p1068_p10  ;;  %p1074_p3 = scmp.lt.s32.totalorder %s1072_s15, %s1066_s16 }
  0x44   : > { %971 = vmatprep.mubr.msk.bf16.mxu1 %vm1138_vm0, %v1137_v0 }
  0x45   : > { %958 = vmatpush3.bf16.msra.mxu0 %v584_v33  ;;  %v641_v29 = vsub.s32 %v638_v27, %v640_v28  ;;  %v660_v33 = vsub.s32 0, %v640_v28  ;;  %p1075_p4 = por %p1074_p3, %p1073_p2 }
  0x47   : > { %p1076_p7 = pnand %p1075_p4, %p1069_p12 }
 0x113   : > { %v450_v11 = vpop.f32.mrb[0].mxu0 }
 0x114   : > { %v464_v12 = vadd.f32 %v911_v10, %v450_v11  ;;  %v945_v13 = vpop.f32.mrb[1].mxu0 }
 0x115   : > { %v453_v14 = vpop.f32.mrb[2].mxu0 }
 0x116   : > { %v465_v15 = vadd.f32 %v911_v10, %v453_v14  ;;  %v946_v16 = vpop.f32.mrb[3].mxu0  ;;  %v466_v17 = vsel %vm412_vm1, %v464_v12, 0.0  ;;  %v472_v18 = vmul.f32 %v464_v12, %v464_v12 }
 0x117   : > { %467 = vadd.xlane.f32.xlu0 %v466_v17 }
 0x118   : > { %v474_v19 = vsel %vm412_vm1, %v472_v18, 0.0  ;;  %v473_v20 = vmul.f32 %v465_v15, %v465_v15  ;;  %v469_v21 = vsel %vm412_vm1, %v465_v15, 0.0 }
 0x119   : > { %475 = vadd.xlane.f32.xlu1 %v474_v19 }
 0x11a   : > { %v477_v22 = vsel %vm412_vm1, %v473_v20, 0.0  ;;  %v570_v20 = vpop.f32.mrb[0].mxu1 }
 0x11b   : > { %470 = vadd.xlane.f32.xlu0 %v469_v21  ;;  %v953_v21 = vpop.f32.mrb[1].mxu1 }
 0x11d   : > { %478 = vadd.xlane.f32.xlu1 %v477_v22  ;;  %v573_v22 = vpop.f32.mrb[2].mxu1 }
 0x11e   : > { %v954_v23 = vpop.f32.mrb[3].mxu1 }
 0x1a4   : > { %v468_v35 = vpop.xlane.xlu0 %467 }
 0x1a5   : > { %v480_v36 = vmul.f32 0.03125, %v468_v35 }
 0x1a6   : > { %v476_v37 = vpop.xlane.xlu1 %475 }
 0x1a7   : > { %v484_v38 = vmul.f32 %v480_v36, %v480_v36  ;;  %v482_v39 = vmul.f32 0.03125, %v476_v37  ;;  %v488_v49 = vsub.f32 %v464_v12, %v480_v36 }
 0x1a8   : > { %v471_v40 = vpop.xlane.xlu0 %470 }
 0x1a9   : > { %v486_v41 = vsub.f32 %v482_v39, %v484_v38  ;;  %v481_v42 = vmul.f32 0.03125, %v471_v40  ;;  %v916_v40 = vld [vmem:[%s1446_s6] ss:$0 sm:$0xff] }
 0x1aa   : > { %v479_v43 = vpop.xlane.xlu1 %478 }
 0x1ab   : > { %v490_v44 = vadd.f32 1e-05, %v486_v41  ;;  %v485_v45 = vmul.f32 %v481_v42, %v481_v42  ;;  %v483_v46 = vmul.f32 0.03125, %v479_v43  ;;  %v489_v55 = vsub.f32 %v465_v15, %v481_v42 }
 0x1ad   : > { %1030 = vrsqrt.f32 %v490_v44  ;;  %v487_v47 = vsub.f32 %v483_v46, %v485_v45 }
 0x1af   : > { %v491_v48 = vadd.f32 1e-05, %v487_v47 }
 0x1b1   : > { %1032 = vrsqrt.f32 %v491_v48 }
 0x1b7   : > { %v1031_v50 = vpop.eup %1030 }
 0x1b8   : > { %v494_v52 = vmul.f32 %v1031_v50, %v488_v49 }
 0x1ba   : > { %v503_v54 = vmul.f32 %v912_v51, %v494_v52  ;;  %v746_v52 = vld [vmem:[%s1449_s9] sm:$0xff] }
 0x1bb   : > { %v1033_v56 = vpop.eup %1032 }
 0x1bc   : > { %v512_v57 = vadd.f32 %v913_v53, %v503_v54  ;;  %v495_v58 = vmul.f32 %v1033_v56, %v489_v55  ;;  %v748_v55 = vld [vmem:[%s1449_s9 + $0x10] sm:$0xff]  ;;  %v749_v56 = vld [vmem:[%s1449_s9 + $0x18] sm:$0xff] }
 0x1be   : > { %v514_v59 = vmax.f32 %v512_v57, 0.0  ;;  %v504_v60 = vmul.f32 %v912_v51, %v495_v58  ;;  %v755_v57 = vpack.c.bf16 %v749_v56, %v748_v55  ;;  %v750_v58 = vld [vmem:[%s1449_s9 + $0x20] sm:$0xff] }
 0x1c0   : > { %v516_v61 = vsel %vm412_vm1, %v514_v59, -inf  ;;  %v513_v62 = vadd.f32 %v913_v53, %v504_v60  ;;  %v747_v53 = vld [vmem:[%s1449_s9 + $0x8] sm:$0xff] }
 0x1c1   : > { %v517_v63 = vrot.slane %v516_v61, 4  ;;  %v754_v54 = vpack.c.bf16 %v747_v53, %v746_v52  ;;  %v751_v59 = vld [vmem:[%s1449_s9 + $0x28] sm:$0xff] }
 0x1c2   : > { %v515_v1 = vmax.f32 %v513_v62, 0.0  ;;  %v756_v60 = vpack.c.bf16 %v751_v59, %v750_v58  ;;  %v753_v62 = vld [vmem:[%s1449_s9 + $0x38] sm:$0xff] }
 0x1c3   : > { %v518_v2 = vmax.f32 %v516_v61, %v517_v63  ;;  %964 = vmatpush3.bf16.msra.mxu1 %v754_v54  ;;  %v752_v61 = vld [vmem:[%s1449_s9 + $0x30] sm:$0xff] }
 0x1c4   : > { %v523_v3 = vsel %vm412_vm1, %v515_v1, -inf  ;;  %965 = vmatprep.subr.bf16.mxu1 %v1137_v0  ;;  %v757_v63 = vpack.c.bf16 %v753_v62, %v752_v61 }
 0x1c5   : > { %v524_v4 = vrot.slane %v523_v3, 4  ;;  %v519_v5 = vrot.slane %v518_v2, 2 }
 0x1c7   : > { %v520_v6 = vmax.f32 %v518_v2, %v519_v5  ;;  %v525_v7 = vmax.f32 %v523_v3, %v524_v4  ;;  %966 = vmatpush3.bf16.msra.mxu1 %v755_v57 }
 0x1c8   : > { %967 = vmatprep.subr.bf16.mxu1 %v1137_v0 }
 0x1c9   : > { %v521_v8 = vrot.slane %v520_v6, 1  ;;  %v526_v9 = vrot.slane %v525_v7, 2 }
 0x1cb   : > { %v522_v10 = vmax.f32 %v520_v6, %v521_v8  ;;  %v527_v11 = vmax.f32 %v525_v7, %v526_v9  ;;  %968 = vmatpush3.bf16.msra.mxu1 %v756_v60 }
 0x1cc   : > { %969 = vmatprep.subr.bf16.mxu1 %v1137_v0  ;;  %v917_v0 = vld [vmem:[%s1447_s7] ss:$0 sm:$0xff] }
 0x1cd   : > { %v528_v12 = vrot.slane %v527_v11, 1  ;;  %v577_v14 = vpack.c.bf16 %v522_v10, %v522_v10 }
 0x1cf   : > { %v529_v13 = vmax.f32 %v527_v11, %v528_v12  ;;  %v587_v16 = vunpack.c.l.b16 %v577_v14  ;;  %970 = vmatpush3.bf16.msra.mxu1 %v757_v63 }
 0x1d1   : > { %v578_v15 = vpack.c.bf16 %v529_v13, %v529_v13 }
 0x1d3   : > { %v588_v17 = vunpack.c.l.b16 %v578_v15 }
 0x1d5   : > { %v590_v18 = vsel %vm589_vm2, %v588_v17, %v587_v16 }
 0x1d6   : > { %v591_v19 = vpack.c.b16 %v590_v18, %v590_v18 }
 0x1d8   : > { %960 = vmatmul.mubr.msk.bf16.vlgmr.msra.gmra.mrb[4].mxu0 %vm412_vm1, %v591_v19 }
 0x2ab   : > { %v629_v30 = vpop.f32.mrb[4].mxu0 }
 0x2ac   : > { %v642_v31 = vrot.slane %v629_v30, %v641_v29  ;;  %v961_v32 = vpop.f32.mrb[5].mxu0 }
 0x2ad   : > { %v632_v34 = vpop.f32.mrb[6].mxu0 }
 0x2ae   : > { %v643_v35 = vcombine.high %v642_v31, %v642_v31  ;;  %v650_v36 = vrot.slane %v642_v31, %v641_v29  ;;  %v962_v37 = vpop.f32.mrb[7].mxu0 }
 0x2b0   : > { %v661_v38 = vrot.slane %v650_v36, %v660_v33  ;;  %v657_v39 = vrot.slane %v643_v35, %v641_v29 }
 0x2b2   : > { %v668_v41 = vadd.f32 %v661_v38, %v570_v20  ;;  %v665_v42 = vrot.slane %v657_v39, %v660_v33  ;;  %v918_v20 = vld [vmem:[%s1448_s8] ss:$0 sm:$0xff] }
 0x2b4   : > { %v677_v43 = vadd.f32 %v916_v40, %v668_v41  ;;  %v669_v44 = vadd.f32 %v665_v42, %v573_v22 }
 0x2b6   : > { %v678_v45 = vadd.f32 %v916_v40, %v669_v44  ;;  %v680_v46 = vsel %vm679_vm3, %v677_v43, 0.0  ;;  %v686_v47 = vmul.f32 %v677_v43, %v677_v43 }
 0x2b7   : > { %681 = vadd.xlane.f32.xlu0 %v680_v46 }
 0x2b8   : > { %v683_v48 = vsel %vm679_vm3, %v678_v45, 0.0  ;;  %v687_v49 = vmul.f32 %v678_v45, %v678_v45  ;;  %v688_v50 = vsel %vm679_vm3, %v686_v47, 0.0 }
 0x2b9   : > { %684 = vadd.xlane.f32.xlu1 %v683_v48  ;;  %v919_v48 = vld [vmem:[%s1450_s10] ss:$0 sm:$0xff] }
 0x2ba   : > { %v691_v51 = vsel %vm679_vm3, %v687_v49, 0.0 }
 0x2bb   : > { %689 = vadd.xlane.f32.xlu0 %v688_v50 }
 0x2bd   : > { %692 = vadd.xlane.f32.xlu1 %v691_v51 }
 0x344   : > { %v682_v1 = vpop.xlane.xlu0 %681 }
 0x345   : > { %v694_v2 = vmul.f32 0.015625, %v682_v1 }
 0x346   : > { %v685_v3 = vpop.xlane.xlu1 %684 }
 0x347   : > { %v695_v4 = vmul.f32 0.015625, %v685_v3  ;;  %v698_v6 = vmul.f32 %v694_v2, %v694_v2  ;;  %v702_v15 = vsub.f32 %v677_v43, %v694_v2 }
 0x348   : > { %v690_v5 = vpop.xlane.xlu0 %689 }
 0x349   : > { %v696_v7 = vmul.f32 0.015625, %v690_v5  ;;  %v699_v9 = vmul.f32 %v695_v4, %v695_v4  ;;  %v703_v17 = vsub.f32 %v678_v45, %v695_v4 }
 0x34a   : > { %v693_v8 = vpop.xlane.xlu1 %692 }
 0x34b   : > { %v700_v10 = vsub.f32 %v696_v7, %v698_v6  ;;  %v697_v11 = vmul.f32 0.015625, %v693_v8 }
 0x34d   : > { %v704_v12 = vadd.f32 1e-05, %v700_v10  ;;  %v701_v13 = vsub.f32 %v697_v11, %v699_v9 }
 0x34f   : > { %1034 = vrsqrt.f32 %v704_v12  ;;  %v705_v14 = vadd.f32 1e-05, %v701_v13 }
 0x351   : > { %1036 = vrsqrt.f32 %v705_v14 }
 0x359   : > { %v1035_v16 = vpop.eup %1034 }
 0x35a   : > { %v708_v18 = vmul.f32 %v1035_v16, %v702_v15 }
 0x35b   : > { %v1037_v19 = vpop.eup %1036 }
 0x35c   : > { %v717_v21 = vmul.f32 %v917_v0, %v708_v18  ;;  %v709_v22 = vmul.f32 %v1037_v19, %v703_v17 }
 0x35e   : > { %v726_v23 = vadd.f32 %v918_v20, %v717_v21  ;;  %v718_v24 = vmul.f32 %v917_v0, %v709_v22 }
 0x360   : > { %v728_v25 = vmax.f32 %v726_v23, 0.0  ;;  %v727_v26 = vadd.f32 %v918_v20, %v718_v24 }
 0x362   : > { %v730_v27 = vsel %vm679_vm3, %v728_v25, -inf  ;;  %v729_v28 = vmax.f32 %v727_v26, 0.0 }
 0x363   : > { %v731_v29 = vrot.slane %v730_v27, 4 }
 0x364   : > { %v737_v30 = vsel %vm679_vm3, %v729_v28, -inf }
 0x365   : > { %v732_v31 = vmax.f32 %v730_v27, %v731_v29  ;;  %v738_v32 = vrot.slane %v737_v30, 4 }
 0x367   : > { %v739_v33 = vmax.f32 %v737_v30, %v738_v32  ;;  %v733_v34 = vrot.slane %v732_v31, 2 }
 0x369   : > { %v734_v35 = vmax.f32 %v732_v31, %v733_v34  ;;  %v740_v36 = vrot.slane %v739_v33, 2 }
 0x36b   : > { %v735_v37 = vrot.slane %v734_v35, 1  ;;  %v741_v38 = vmax.f32 %v739_v33, %v740_v36 }
 0x36d   : > { %v736_v39 = vmax.f32 %v734_v35, %v735_v37  ;;  %v742_v40 = vrot.slane %v741_v38, 1 }
 0x36f   : > { %v743_v41 = vmax.f32 %v741_v38, %v742_v40  ;;  %v744_v42 = vpack.c.bf16 %v736_v39, %v736_v39 }
 0x371   : > { %v745_v43 = vpack.c.bf16 %v743_v41, %v743_v41  ;;  %v767_v44 = vunpack.c.l.b16 %v744_v42 }
 0x373   : > { %v768_v45 = vunpack.c.l.b16 %v745_v43 }
 0x375   : > { %v769_v46 = vsel %vm589_vm2, %v768_v45, %v767_v44 }
 0x376   : > { %v770_v47 = vpack.c.b16 %v769_v46, %v769_v46 }
 0x378   : > { %972 = vmatmul.mubr.msk.bf16.vlgmr.msra.gmra.mrb[4].mxu1 %vm679_vm3, %v770_v47 }
 0x44b   : > { %v808_v49 = vpop.f32.mrb[4].mxu1 }
 0x44c   : > { %v809_v50 = vadd.f32 %v919_v48, %v808_v49  ;;  %v973_v51 = vpop.f32.mrb[5].mxu1 }
 0x44d   : > { %v811_v52 = vpop.f32.mrb[6].mxu1 }
 0x44e   : > { %v974_v53 = vpop.f32.mrb[7].mxu1  ;;  %815 = vst.msk [vmem:[%s395_s24] sm:$0x3] %vm814_vm4, %v809_v50 }
 0x44f   : > { %1079 = shalt.err (!%p1076_p7)
}
 0x450   : > { %s1080_s25 = scalar_lea.hbm %s1398_s13, 32  ;;  %s1084_s29 = scalar_lea.hbm %s1451_s11, 64 }
 0x451   : > { %p1081_p8 = scmp.ne.s32.totalorder %s1398_s13, %s1080_s25  ;;  %p1085_p1 = scmp.lt.u32.totalorder %s1398_s13, %s1451_s11 }
 0x452   : > { %p1086_p0 = scmp.lt.u32.totalorder %s1084_s29, %s1080_s25  ;;  %p1088_p6 = scmp.lt.u32.totalorder %s1080_s25, %s1398_s13 }
 0x453   : > { %p1082_p11 = pnand %p1081_p8, %p1463_p9 }
 0x454   : > { %p1087_p5 = por %p1086_p0, %p1085_p1 }
 0x455   : > { %p1083_p13 = pneg %p1082_p11 }
 0x456   : > { %p1089_p10 = por %p1088_p6, %p1087_p5 }
 0x458   : > { %p1090_p12 = pnand %p1089_p10, %p1083_p13 }
 0x45a   : > { %1093 = shalt.err (!%p1090_p12)
}
 0x45b   : > { %979 = dma.vmem_to_hbm [thread:$0]  (%p1463_p9), %s1400_s26, 32, %s1398_s13, %s817_s21  }
 0x45c PF: > { %p991_p2 = scmp.ge.s32.totalorder %s1132_s20, 2  ;;  %s842_s16 = sand.u32 1, %s1120_s17  }
 0x45d   : > { %p1464_p3 = scmp.ne.s32.totalorder %s1457_s28, 0  ;;  %s843_s14 = scalar_lea.sflag [#allocation4], %s842_s16 }
 0x45f   : > { %p986_p4 = pnand %p991_p2, %p1464_p3 }
 0x461   : > { %1115 = dma.done.wait (!%p986_p4), %s843_s14, 32  }
 0x462   : > { %1117 = vsyncadd (!%p986_p4), %s843_s14, 4294967264  ;;  %s1465_s15 = sld [smem:[#allocation8_spill]]  ;;  %p22_p7 = scmp.ge.s32.totalorder %s1226_s23, 4  }
 0x463   : > { %s1466_s17 = smov %s1124_s18  ;;  %s1467_s18 = smov %s1128_s19 }
 0x464   : > { %s1469_s20 = smov %s1226_s23  ;;  %24 = sbr.rel (!%p22_p7) target bundleno = 4 (0x4), region = 104 }
 0x468   : > { %s1468_s19 = smov %s1465_s15 }
 0x46b   :  { %848 = vsyncpa [#allocation3], 1 }
 0x46c   :  { %850 = vsyncpa [#allocation3 + $0x1], 1 }
 0x46d   :  { %851 = vsyncpa [#allocation4], 1 }
 0x46e   :  { %853 = vsyncpa [#allocation4 + $0x1], 1 }

</bundles_post_ra>
